<compile_context>
chip_gen: v6e
topology: v6e:2x2x1
jax: 0.10.0
libtpu: 0.0.40
codegen_flags: <defaults>
</compile_context>

<pallas_src>
import functools

import jax
import jax.numpy as jnp
from jax.experimental import pallas as pl
from jax.experimental.pallas import tpu as pltpu

LANE = 128  # TPU lane width; padded hidden dims are multiples of this.


def mlp_kernel(x_ref, w_ref, b_ref, o_ref):
    """x_ref: [TM, in_features]   input rows at natural (unpadded) width
       w_ref: [3, 128, 128]       packed zero-padded weights (W1, W2, W3), bf16
       b_ref: [3, 128]            packed zero-padded biases  (b1, b2, b3), f32
       o_ref: [TM, out_features]  output at natural width

    Padding is numerically exact: padded bias entries are 0, tanh(0) == 0, and
    zero rows/cols of the padded weights contribute nothing to the matmuls.
    bf16 operands / f32 accumulation for the MXU; bias add + tanh stay f32.
    """
    k_in = x_ref.shape[-1]     # real input width (static)
    n_out = o_ref.shape[-1]    # real output width (static)

    x = x_ref[...].astype(jnp.bfloat16)

    # Layer 1: tanh(x @ W1 + b1)  — K restricted to the live rows of padded W1.
    h1 = jnp.tanh(
        jnp.dot(x, w_ref[0, :k_in, :], preferred_element_type=jnp.float32)
        + b_ref[0:1, :]
    )
    # Layer 2: h1 @ W2 + b2   (no activation, matches the PyTorch forward)
    h2 = (
        jnp.dot(h1.astype(jnp.bfloat16), w_ref[1],
                preferred_element_type=jnp.float32)
        + b_ref[1:2, :]
    )
    # Layer 3: h2 @ W3 + b3
    h3 = (
        jnp.dot(h2.astype(jnp.bfloat16), w_ref[2],
                preferred_element_type=jnp.float32)
        + b_ref[2:3, :]
    )
    # Store only the real output columns (narrow lane-masked store; at large
    # batch the saved HBM bytes dominate the masked-vst penalty).
    o_ref[...] = h3[:, :n_out].astype(o_ref.dtype)


def pack_params(w1, b1, w2, b2, w3, b3):
    """Zero-pad each weight to [128,128] (bf16) and bias to [128] (f32), stack
    into one weight slab and one bias slab -> 2 parameter DMAs per call."""
    def pad_w(w):
        r, c = w.shape
        return jnp.pad(w, ((0, LANE - r), (0, LANE - c))).astype(jnp.bfloat16)

    def pad_b(b):
        b = b.reshape(-1)
        return jnp.pad(b, (0, LANE - b.shape[0])).astype(jnp.float32)

    w_slab = jnp.stack([pad_w(w1), pad_w(w2), pad_w(w3)])   # [3, 128, 128] bf16
    b_slab = jnp.stack([pad_b(b1), pad_b(b2), pad_b(b3)])   # [3, 128]      f32
    return w_slab, b_slab


def _round_up(n, m):
    return ((n + m - 1) // m) * m


def _pick_tm(batch):
    """Batch-tile rows.  Big tiles amortize the ~0.35 µs per-grid-step overhead
    (measured ~85-86% of HBM roofline at 512-1024 rows); keep >=2 grid steps
    when batch allows so both v7x TensorCores get work."""
    b8 = _round_up(batch, 8)
    if b8 <= 16:
        return b8
    return min(1024, _round_up((b8 + 1) // 2, 8))


@functools.partial(jax.jit, static_argnames=("out_features",))
def mlp_forward(x, w_slab, b_slab, out_features):
    batch, in_features = x.shape
    tm = _pick_tm(batch)
    grid = (pl.cdiv(batch, tm),)

    return pl.pallas_call(
        mlp_kernel,
        out_shape=jax.ShapeDtypeStruct((batch, out_features), jnp.float32),
        grid_spec=pltpu.PrefetchScalarGridSpec(
            num_scalar_prefetch=0,
            grid=grid,
            in_specs=[
                # x at natural width: last dim == full array dim (legal block).
                pl.BlockSpec((tm, in_features), lambda i: (i, 0)),
                # Weight / bias slabs are VMEM-resident across the grid.
                pl.BlockSpec((3, LANE, LANE), lambda i: (0, 0, 0)),
                pl.BlockSpec((3, LANE), lambda i: (0, 0)),
            ],
            # Output at natural width: last dim == full array dim (legal block).
            out_specs=pl.BlockSpec((tm, out_features), lambda i: (i, 0)),
        ),
        compiler_params=pltpu.CompilerParams(
            # Batch axis is independent -> shard across both TensorCores.
            dimension_semantics=("parallel",),
            # Explicit budget (tiles + slabs are << this even at tm=1024;
            # comfortably inside v7x's 64 MiB physical VMEM).
            vmem_limit_bytes=32 * 1024 * 1024,
        ),
    )(x, w_slab, b_slab)


def init_linear(key, fan_in, fan_out):
    # Deterministic init mimicking nn.Linear's uniform(-1/sqrt(fan_in), ...).
    # Weights stored as [in, out] (transposed vs. PyTorch) for x @ W.
    kw, kb = jax.random.split(key)
    bound = 1.0 / jnp.sqrt(fan_in)
    w = jax.random.uniform(kw, (fan_in, fan_out), jnp.float32, -bound, bound)
    b = jax.random.uniform(kb, (fan_out,), jnp.float32, -bound, bound)
    return w, b


if __name__ == "__main__":
    input_size, hidden_size, output_size = 32, 64, 16
    batch = 8

    key = jax.random.PRNGKey(0)
    kx, k1, k2, k3 = jax.random.split(key, 4)

    x = jax.random.normal(kx, (batch, input_size), jnp.float32)
    w1, b1 = init_linear(k1, input_size, hidden_size)
    w2, b2 = init_linear(k2, hidden_size, 100)
    w3, b3 = init_linear(k3, 100, output_size)

    # Pack/pad parameters once (outside the per-call path).
    w_slab, b_slab = pack_params(w1, b1, w2, b2, w3, b3)

    out = mlp_forward(x, w_slab, b_slab, output_size)
    jax.block_until_ready(out)

    # Pure-JAX f32 reference of the same forward pass (unpadded math).
    # Kernel uses bf16 matmul operands (f32 accumulate), so tolerances are
    # relaxed accordingly.
    ref = jnp.tanh(x @ w1 + b1) @ w2 + b2
    ref = ref @ w3 + b3
    assert out.shape == (batch, output_size)
    assert jnp.allclose(out, ref, atol=3e-2, rtol=3e-2), float(
        jnp.max(jnp.abs(out - ref))
    )

    print("KERNEL_OK")
</pallas_src>

<mosaic_0001>
module attributes {stable_mosaic.version = 11 : i64} {
  func.func @mlp_kernel(%arg0: i32, %arg1: memref<8x32xf32, #tpu.memory_space<vmem>>, %arg2: memref<3x128x128xbf16, #tpu.memory_space<vmem>>, %arg3: memref<3x128xf32, #tpu.memory_space<vmem>>, %arg4: memref<8x16xf32, #tpu.memory_space<vmem>>) attributes {dimension_semantics = [#tpu.dimension_semantics<parallel>], iteration_bounds = array<i64: 1>, scalar_prefetch = 0 : i64, scratch_operands = 0 : i64, tpu.core_type = #tpu.core_type<tc>, window_params = [{transform_indices = @transform_0, window_bounds = array<i64: 8, 32>}, {pipeline_mode = #tpu.pipeline_mode<synchronous>, transform_indices = @transform_1, window_bounds = array<i64: 3, 128, 128>}, {pipeline_mode = #tpu.pipeline_mode<synchronous>, transform_indices = @transform_2, window_bounds = array<i64: 3, 128>}, {transform_indices = @transform_3, window_bounds = array<i64: 8, 16>}]} {
    %c0 = arith.constant 0 : index
    %c0_0 = arith.constant 0 : index
    %0 = vector.load %arg1[%c0, %c0_0] : memref<8x32xf32, #tpu.memory_space<vmem>>, vector<8x32xf32>
    %1 = arith.truncf %0 : vector<8x32xf32> to vector<8x32xbf16>
    %c0_1 = arith.constant 0 : index
    %c0_2 = arith.constant 0 : index
    %c0_3 = arith.constant 0 : index
    %2 = vector.load %arg2[%c0_1, %c0_2, %c0_3] : memref<3x128x128xbf16, #tpu.memory_space<vmem>>, vector<1x32x128xbf16>
    %3 = vector.shape_cast %2 : vector<1x32x128xbf16> to vector<32x128xbf16>
    %cst = arith.constant dense<0.000000e+00> : vector<8x128xf32>
    %4 = tpu.matmul %1, %3, %cst {dimension_numbers = #tpu.dot_dimension_numbers<[1], [0], [0], [1], [0, 0, 1, 1], [], []>} : vector<8x32xbf16>, vector<32x128xbf16>, vector<8x128xf32> -> vector<8x128xf32>
    %c0_4 = arith.constant 0 : index
    %c0_5 = arith.constant 0 : index
    %5 = vector.load %arg3[%c0_4, %c0_5] : memref<3x128xf32, #tpu.memory_space<vmem>>, vector<1x128xf32>
    %6 = vector.broadcast %5 : vector<1x128xf32> to vector<8x128xf32>
    %7 = arith.addf %4, %6 : vector<8x128xf32>
    %8 = math.tanh %7 : vector<8x128xf32>
    %9 = arith.truncf %8 : vector<8x128xf32> to vector<8x128xbf16>
    %c1 = arith.constant 1 : index
    %c0_6 = arith.constant 0 : index
    %c0_7 = arith.constant 0 : index
    %10 = vector.load %arg2[%c1, %c0_6, %c0_7] : memref<3x128x128xbf16, #tpu.memory_space<vmem>>, vector<1x128x128xbf16>
    %11 = vector.shape_cast %10 : vector<1x128x128xbf16> to vector<128x128xbf16>
    %cst_8 = arith.constant dense<0.000000e+00> : vector<8x128xf32>
    %12 = tpu.matmul %9, %11, %cst_8 {dimension_numbers = #tpu.dot_dimension_numbers<[1], [0], [0], [1], [0, 0, 1, 1], [], []>} : vector<8x128xbf16>, vector<128x128xbf16>, vector<8x128xf32> -> vector<8x128xf32>
    %c1_9 = arith.constant 1 : index
    %c0_10 = arith.constant 0 : index
    %13 = vector.load %arg3[%c1_9, %c0_10] : memref<3x128xf32, #tpu.memory_space<vmem>>, vector<1x128xf32>
    %14 = vector.broadcast %13 : vector<1x128xf32> to vector<8x128xf32>
    %15 = arith.addf %12, %14 : vector<8x128xf32>
    %16 = arith.truncf %15 : vector<8x128xf32> to vector<8x128xbf16>
    %c2 = arith.constant 2 : index
    %c0_11 = arith.constant 0 : index
    %c0_12 = arith.constant 0 : index
    %17 = vector.load %arg2[%c2, %c0_11, %c0_12] : memref<3x128x128xbf16, #tpu.memory_space<vmem>>, vector<1x128x128xbf16>
    %18 = vector.shape_cast %17 : vector<1x128x128xbf16> to vector<128x128xbf16>
    %cst_13 = arith.constant dense<0.000000e+00> : vector<8x128xf32>
    %19 = tpu.matmul %16, %18, %cst_13 {dimension_numbers = #tpu.dot_dimension_numbers<[1], [0], [0], [1], [0, 0, 1, 1], [], []>} : vector<8x128xbf16>, vector<128x128xbf16>, vector<8x128xf32> -> vector<8x128xf32>
    %c2_14 = arith.constant 2 : index
    %c0_15 = arith.constant 0 : index
    %20 = vector.load %arg3[%c2_14, %c0_15] : memref<3x128xf32, #tpu.memory_space<vmem>>, vector<1x128xf32>
    %21 = vector.broadcast %20 : vector<1x128xf32> to vector<8x128xf32>
    %22 = arith.addf %19, %21 : vector<8x128xf32>
    %23 = vector.extract_strided_slice %22 {offsets = [0, 0], sizes = [8, 16], strides = [1, 1]} : vector<8x128xf32> to vector<8x16xf32>
    %c0_16 = arith.constant 0 : index
    %c0_17 = arith.constant 0 : index
    %24 = vector.load %arg4[%c0_16, %c0_17] : memref<8x16xf32, #tpu.memory_space<vmem>>, vector<8x16xf32>
    tpu.vector_store %arg4[%c0_16, %c0_17], %23 {strides = array<i32>} : memref<8x16xf32, #tpu.memory_space<vmem>>, vector<8x16xf32>,
    return
  }
  func.func @transform_0(%arg0: i32) -> (i32, i32) {
    %c0_i32 = arith.constant 0 : i32
    %c0_i32_0 = arith.constant 0 : i32
    return %arg0, %c0_i32 : i32, i32
  }
  func.func @transform_1(%arg0: i32) -> (i32, i32, i32) {
    %c0_i32 = arith.constant 0 : i32
    %c0_i32_0 = arith.constant 0 : i32
    %c0_i32_1 = arith.constant 0 : i32
    %c0_i32_2 = arith.constant 0 : i32
    return %c0_i32, %c0_i32_0, %c0_i32_1 : i32, i32, i32
  }
  func.func @transform_2(%arg0: i32) -> (i32, i32) {
    %c0_i32 = arith.constant 0 : i32
    %c0_i32_0 = arith.constant 0 : i32
    %c0_i32_1 = arith.constant 0 : i32
    return %c0_i32, %c0_i32_0 : i32, i32
  }
  func.func @transform_3(%arg0: i32) -> (i32, i32) {
    %c0_i32 = arith.constant 0 : i32
    %c0_i32_0 = arith.constant 0 : i32
    return %arg0, %c0_i32 : i32, i32
  }
}

</mosaic_0001>

<bundles_post_ra>
// kernel: mlp_forward.1
= control target key start
LH: loop header
LB: loop body
LE: loop exit
PB: predicated region body
PF: predicated region fallthrough
CT: control target
= control target key end

     0   :  { %8 = vsyncpa [#allocation3], 0  ;;  %s609_s0 = inlined_call_operand.hbm [shape: f32[8,32], index: 0, kind: input, shape index: {}]   ;;  %s610_s1 = inlined_call_operand.hbm [shape: bf16[3,128,128], index: 1, kind: input, shape index: {}]   ;;  %s611_s2 = inlined_call_operand.hbm [shape: f32[3,128], index: 2, kind: input, shape index: {}]   ;;  %s612_s3 = inlined_call_operand.hbm [shape: f32[8,16], index: 3, kind: output, shape index: {}]  }
   0x1   :  { %9 = vsyncpa [#allocation6], 0 }
   0x2   :  { %10 = vsyncpa [#allocation4], 0  ;;  %s566_s12 = smov [#allocation5]  }
   0x3   :  { %s26_s13 = sshll.u32 %s566_s12, 4  ;;  %s27_s13 = int_to_ptr.vmem [resolvable:$true] %s26_s13 }
   0x4   :  { %s488_s14 = scalar_lea.vmem %s27_s13, 3072  ;;  %p493_p1 = scmp.lt.s32.totalorder %s27_s13, %s27_s13 }
   0x5   :  { %p489_p0 = scmp.ne.s32.totalorder %s27_s13, %s488_s14  ;;  %p494_p2 = scmp.lt.s32.totalorder %s488_s14, %s488_s14 }
   0x7   :  { %p495_p3 = por %p494_p2, %p493_p1 }
   0x9   :  { %p496_p4 = pnand %p495_p3, %p489_p0 }
   0xb   :  { %499 = shalt.err (!%p496_p4)
}
   0xc   :  { %s567_s15 = smov 64   ;;  %s568_s16 = smov 4  }
   0xd   :  { %32 = dma.hbm_to_vmem [thread:$0]  %s610_s1, 3072, %s27_s13, [#allocation6], %s567_s15, %s567_s15, %s568_s16  }
   0xe   :  { %s569_s19 = smov [#allocation2]   ;;  %s570_s21 = smov [#allocation7]  }
   0xf   :  { %s17_s20 = sshll.u32 %s569_s19, 4  ;;  %s39_s22 = sshll.u32 %s570_s21, 4  ;;  %s18_s20 = int_to_ptr.vmem [resolvable:$true] %s17_s20  ;;  %s40_s22 = int_to_ptr.vmem [resolvable:$true] %s39_s22 }
  0x10   :  { %s508_s23 = scalar_lea.vmem %s18_s20, 128  ;;  %p513_p6 = scmp.lt.s32.totalorder %s18_s20, %s18_s20 }
  0x11   :  { %p509_p5 = scmp.ne.s32.totalorder %s18_s20, %s508_s23  ;;  %p514_p7 = scmp.lt.s32.totalorder %s508_s23, %s508_s23 }
  0x13   :  { %p515_p8 = por %p514_p7, %p513_p6 }
  0x15   :  { %p516_p9 = pnand %p515_p8, %p509_p5 }
  0x17   :  { %519 = shalt.err (!%p516_p9)
}
  0x18   :  { %20 = dma.hbm_to_vmem [thread:$0]  %s609_s0, 128, %s18_s20, [#allocation3]  }
  0x19   :  { %s528_s26 = scalar_lea.vmem %s40_s22, 64  ;;  %p533_p11 = scmp.lt.s32.totalorder %s40_s22, %s40_s22 }
  0x1a   :  { %p529_p10 = scmp.ne.s32.totalorder %s40_s22, %s528_s26  ;;  %p534_p12 = scmp.lt.s32.totalorder %s528_s26, %s528_s26 }
  0x1c   :  { %p535_p13 = por %p534_p12, %p533_p11 }
  0x1e   :  { %p536_p0 = pnand %p535_p13, %p529_p10 }
  0x20   :  { %539 = shalt.err (!%p536_p0)
}
  0x21   :  { %42 = dma.hbm_to_vmem [thread:$0]  %s611_s2, 64, %s40_s22, [#allocation6]  }
  0x22   :  { %560 = dma.done.wait [#allocation3], 128  }
  0x23   :  { %561 = vsyncadd [#allocation3], 4294967168 }
  0x24   :  { %562 = dma.done.wait [#allocation6], 3136  }
  0x25   :  { %563 = vsyncadd [#allocation6], 4294964160  ;;  %v571_v0 = vmov 0.0   ;;  %vm572_vm0 = vmmov 0   ;;  %v460_v1 = vld [vmem:[#allocation5 + $0x8] sm:$0xff]   ;;  %v461_v2 = vld [vmem:[#allocation5] sm:$0xff]  }
  0x26   :  { %404 = vmatprep.subr.bf16.mxu0 %v571_v0  ;;  %408 = vmatprep.mubr.msk.bf16.mxu0 %vm572_vm0, %v571_v0  ;;  %v53_v3 = vld [vmem:[#allocation2] sm:$0xff]  ;;  %vm76_vm1 = vcmask 261120   ;;  %v463_v6 = vld [vmem:[#allocation5 + $0x70] sm:$0xff]   ;;  %v464_v7 = vld [vmem:[#allocation5 + $0x68] sm:$0xff]   ;;  %s573_s0 = smov [#allocation8]   ;;  %vm343_vm2 = vcmask 130048  }
  0x27   :  { %412 = vmatprep.subr.bf16.mxu1 %v571_v0  ;;  %428 = vmatprep.mubr.msk.bf16.mxu1 %vm572_vm0, %v571_v0  ;;  %v462_v4 = vld [vmem:[#allocation5 + $0x78] sm:$0xff]   ;;  %v54_v5 = vpack.c.bf16 %v53_v3, %v53_v3  ;;  %v465_v8 = vld [vmem:[#allocation5 + $0x60] sm:$0xff]   ;;  %v467_v10 = vld [vmem:[#allocation5 + $0x50] sm:$0xff]   ;;  %s351_s2 = sshll.u32 %s573_s0, 4  ;;  %s352_s2 = int_to_ptr.vmem [resolvable:$true] %s351_s2 }
  0x28   :  { %405 = vmatpush3.bf16.msra.mxu0 %v460_v1  ;;  %413 = vmatpush3.bf16.msra.mxu1 %v462_v4  ;;  %v466_v9 = vld [vmem:[#allocation5 + $0x58] sm:$0xff]   ;;  %v468_v11 = vld [vmem:[#allocation5 + $0x48] sm:$0xff]   ;;  %v469_v12 = vld [vmem:[#allocation5 + $0x40] sm:$0xff]   ;;  %s540_s28 = scalar_lea.vmem %s352_s2, 128  ;;  %p545_p2 = scmp.lt.s32.totalorder %s352_s2, %s352_s2 }
  0x29   :  { %406 = vmatprep.subr.bf16.mxu0 %v571_v0  ;;  %414 = vmatprep.subr.bf16.mxu1 %v571_v0  ;;  %v470_v13 = vld [vmem:[#allocation5 + $0xb8] sm:$0xff]   ;;  %v471_v14 = vld [vmem:[#allocation5 + $0xb0] sm:$0xff]   ;;  %v472_v15 = vld [vmem:[#allocation5 + $0xa8] sm:$0xff]   ;;  %p541_p1 = scmp.ne.s32.totalorder %s352_s2, %s540_s28  ;;  %p546_p3 = scmp.lt.s32.totalorder %s540_s28, %s540_s28 }
  0x2a   :  { %v473_v16 = vld [vmem:[#allocation5 + $0xa0] sm:$0xff]   ;;  %v474_v17 = vld [vmem:[#allocation5 + $0x98] sm:$0xff]   ;;  %v475_v18 = vld [vmem:[#allocation5 + $0x90] sm:$0xff]  }
  0x2b   :  { %v476_v19 = vld [vmem:[#allocation5 + $0x88] sm:$0xff]   ;;  %v361_v20 = vld [vmem:[#allocation7] ss:$0 sm:$0xff]  ;;  %v365_v29 = vld [vmem:[#allocation7 + $0x1] ss:$0 sm:$0xff]  ;;  %p547_p4 = por %p546_p3, %p545_p2 }
  0x2c   :  { %407 = vmatpush3.bf16.msra.mxu0 %v461_v2  ;;  %415 = vmatpush3.bf16.msra.mxu1 %v463_v6  ;;  %v477_v28 = vld [vmem:[#allocation5 + $0x80] sm:$0xff]  }
  0x2d   :  { %432 = vmatprep.subr.bf16.mxu0 %v571_v0  ;;  %416 = vmatprep.subr.bf16.mxu1 %v571_v0  ;;  %v374_v36 = vld [vmem:[#allocation7 + $0x2] ss:$0 sm:$0xff]  ;;  %p548_p5 = pnand %p547_p4, %p541_p1 }
  0x2f   :  { %409 = vmatmul.mubr.msk.bf16.vlgmr.msra.gmra.mxu0 %vm76_vm1, %v54_v5 }
  0x30   :  { %448 = vmatprep.mubr.msk.bf16.mxu0 %vm572_vm0, %v571_v0  ;;  %417 = vmatpush3.bf16.msra.mxu1 %v464_v7 }
  0x31   :  { %418 = vmatprep.subr.bf16.mxu1 %v571_v0  ;;  %433 = vmatpush3.bf16.msra.mxu0 %v470_v13 }
  0x32   :  { %434 = vmatprep.subr.bf16.mxu0 %v571_v0 }
  0x34   :  { %419 = vmatpush3.bf16.msra.mxu1 %v465_v8 }
  0x35   :  { %420 = vmatprep.subr.bf16.mxu1 %v571_v0  ;;  %435 = vmatpush3.bf16.msra.mxu0 %v471_v14 }
  0x36   :  { %436 = vmatprep.subr.bf16.mxu0 %v571_v0 }
  0x38   :  { %421 = vmatpush3.bf16.msra.mxu1 %v466_v9 }
  0x39   :  { %422 = vmatprep.subr.bf16.mxu1 %v571_v0  ;;  %437 = vmatpush3.bf16.msra.mxu0 %v472_v15 }
  0x3a   :  { %438 = vmatprep.subr.bf16.mxu0 %v571_v0 }
  0x3c   :  { %423 = vmatpush3.bf16.msra.mxu1 %v467_v10 }
  0x3d   :  { %424 = vmatprep.subr.bf16.mxu1 %v571_v0  ;;  %439 = vmatpush3.bf16.msra.mxu0 %v473_v16 }
  0x3e   :  { %440 = vmatprep.subr.bf16.mxu0 %v571_v0 }
  0x40   :  { %425 = vmatpush3.bf16.msra.mxu1 %v468_v11 }
  0x41   :  { %426 = vmatprep.subr.bf16.mxu1 %v571_v0  ;;  %441 = vmatpush3.bf16.msra.mxu0 %v474_v17 }
  0x42   :  { %442 = vmatprep.subr.bf16.mxu0 %v571_v0 }
  0x44   :  { %427 = vmatpush3.bf16.msra.mxu1 %v469_v12 }
  0x45   :  { %443 = vmatpush3.bf16.msra.mxu0 %v475_v18 }
  0x46   :  { %444 = vmatprep.subr.bf16.mxu0 %v571_v0 }
  0x49   :  { %445 = vmatpush3.bf16.msra.mxu0 %v476_v19 }
  0x4a   :  { %446 = vmatprep.subr.bf16.mxu0 %v571_v0 }
  0x4d   :  { %447 = vmatpush3.bf16.msra.mxu0 %v477_v28 }
  0xef   :  { %v114_v21 = vpop.f32.mrf.mxu0 }
  0xf0   :  { %v115_v22 = vadd.f32 %v361_v20, %v114_v21 }
  0xf1   :  { %v410_v23 = vpop.f32.mrf.mxu0 }
  0xf2   :  { %478 = vtanh.f32 %v115_v22 }
  0xf3   :  { %v117_v24 = vpop.f32.mrf.mxu0 }
  0xf5   :  { %v411_v25 = vpop.f32.mrf.mxu0 }
  0xff   :  { %v479_v26 = vpop.eup %478 }
 0x100   :  { %v121_v27 = vpack.c.bf16 %v479_v26, %v479_v26 }
 0x102   :  { %429 = vmatmul.mubr.bf16.vlgmr.msra.gmra.mxu1 %v121_v27 }
 0x1c2   :  { %v226_v30 = vpop.f32.mrf.mxu1 }
 0x1c3   :  { %v227_v31 = vadd.f32 %v365_v29, %v226_v30 }
 0x1c4   :  { %v430_v32 = vpop.f32.mrf.mxu1 }
 0x1c5   :  { %v232_v33 = vpack.c.bf16 %v227_v31, %v227_v31 }
 0x1c6   :  { %v229_v34 = vpop.f32.mrf.mxu1 }
 0x1c7   :  { %449 = vmatmul.mubr.bf16.vlgmr.msra.gmra.mxu0 %v232_v33 }
 0x1c8   :  { %v431_v35 = vpop.f32.mrf.mxu1 }
 0x287   :  { %v337_v37 = vpop.f32.mrf.mxu0 }
 0x288   :  { %v338_v38 = vadd.f32 %v374_v36, %v337_v37 }
 0x289   :  { %v450_v39 = vpop.f32.mrf.mxu0 }
 0x28a   :  { %344 = vst.msk [vmem:[#allocation8] sm:$0xff] %vm343_vm2, %v338_v38 }
 0x28b   :  { %v340_v40 = vpop.f32.mrf.mxu0 }
 0x28c   :  { %551 = shalt.err (!%p548_p5)
}
 0x28d   :  { %354 = dma.vmem_to_hbm [thread:$0]  %s352_s2, 128, %s612_s3, [#allocation4]   ;;  %v451_v41 = vpop.f32.mrf.mxu0 }
 0x28e   :  { %564 = dma.done.wait [#allocation4], 128  }
 0x28f   :  { %565 = vsyncadd [#allocation4], 4294967168 }
 0x290   :  { %358 = vsyncpa [#allocation3], 1 }
 0x291   :  { %359 = vsyncpa [#allocation6], 1 }
 0x292   :  { %360 = vsyncpa [#allocation4], 1 }

</bundles_post_ra>
